<compile_context>
chip_gen: v5e
topology: v5e:2x2
jax: 0.10.0
libtpu: 0.0.40
codegen_flags: <defaults>
</compile_context>

<pallas_src>
import functools

import jax
import jax.numpy as jnp
import numpy as np
from jax.experimental import pallas as pl
from jax.experimental.pallas import tpu as pltpu


# ----------------------------------------------------------------------------
# Fully fused kernel: every Linear / PReLU / residual of every ResidualFC block.
# ----------------------------------------------------------------------------
def _scale_fc_kernel(*refs, num_blocks, depth, out_dim, has_rest, has_fc):
    # refs = (x_ref, w0_ref, [wrest_ref], [fcw_ref], vec_ref, o_ref)
    x_ref = refs[0]
    o_ref = refs[-1]
    idx = 1
    w0_ref = refs[idx]; idx += 1
    wrest_ref = None
    if has_rest:
        wrest_ref = refs[idx]; idx += 1
    fcw_ref = None
    if has_fc:
        fcw_ref = refs[idx]; idx += 1
    vec_ref = refs[idx]

    def prelu(v, a):                       # matches torch PReLU (identity at 0)
        return jnp.where(v >= 0, v, a * v)

    vecs = vec_ref[...]                    # (n_vec, out) f32 — tiny, load once
    n_vec_per_block = 3 + 2 * (depth - 1)

    y = x_ref[...].astype(jnp.float32)     # (bm, d_in) f32
    for b in range(num_blocks):
        # concatenated [up_feature_fc | bypass_fc] weight for this block (bf16)
        w_cat = w0_ref[...] if b == 0 else wrest_ref[b - 1]      # (d_in, 2*out)
        vb = b * n_vec_per_block
        up_b = vecs[vb + 0:vb + 1]                               # (1, out) f32
        bp_b = vecs[vb + 1:vb + 2]
        bp_a = vecs[vb + 2:vb + 3]

        # One N = 2*out matmul feeds both the up-feature and bypass paths.
        hb = jnp.dot(y.astype(jnp.bfloat16), w_cat,
                     preferred_element_type=jnp.float32)         # (bm, 2*out) f32
        h = hb[:, :out_dim] + up_b
        byp = hb[:, out_dim:] + bp_b

        # for fc, prelu in zip(fc_modules, prelu_modules): h = fc(prelu(h))
        for d in range(depth - 1):
            fc_b = vecs[vb + 3 + 2 * d: vb + 4 + 2 * d]
            fc_a = vecs[vb + 4 + 2 * d: vb + 5 + 2 * d]
            h = prelu(h, fc_a)
            fw = fcw_ref[b * (depth - 1) + d]                    # (out, out) bf16
            h = jnp.dot(h.astype(jnp.bfloat16), fw,
                        preferred_element_type=jnp.float32) + fc_b

        # bypass_prelu(h + bypass_fc(y))
        y = prelu(h + byp, bp_a)

    o_ref[...] = y.astype(o_ref.dtype)


# ----------------------------------------------------------------------------
# Wrapper: pack params into a few operands, one pallas_call over batch tiles.
# ----------------------------------------------------------------------------
def scale_fc_forward(x, params, *, bm=None):
    """ScaleFCBlock.forward.  x: (B, in_dim) -> (B, out_dim) f32."""
    B, in_dim = x.shape
    blocks = params["blocks"]
    num_blocks = len(blocks)
    depth = params["depth"]
    out_dim = blocks[0]["up_w"].shape[1]

    if bm is None:
        bm = B if B <= 256 else 256        # few fat steps; fill MXU M rows
    bm = min(bm, B)
    assert B % bm == 0, "batch must be divisible by the batch tile"
    # TODO(synk): pad / mask the final tile to support arbitrary B.

    # ---- consolidate tiny params into a handful of stacked operands ----
    w0 = jnp.concatenate([blocks[0]["up_w"], blocks[0]["bp_w"]], axis=1)  # (in,2*out) bf16
    w_rest = None
    if num_blocks > 1:
        w_rest = jnp.stack(
            [jnp.concatenate([b["up_w"], b["bp_w"]], axis=1) for b in blocks[1:]])
    fc_w = None
    if depth > 1:
        fc_w = jnp.stack([w for b in blocks for (w, _, _) in b["fcs"]])
    vec_rows = []
    for b in blocks:
        vec_rows += [b["up_b"], b["bp_b"], b["bp_a"]]
        for (_, fb, fa) in b["fcs"]:
            vec_rows += [fb, fa]
    vecs = jnp.concatenate(vec_rows, axis=0).astype(jnp.float32)          # (n_vec, out)

    operands = [x, w0]
    specs = [
        pl.BlockSpec((bm, in_dim), lambda i: (i, 0)),
        pl.BlockSpec(w0.shape, lambda i: (0, 0)),
    ]
    if w_rest is not None:
        operands.append(w_rest)
        specs.append(pl.BlockSpec(w_rest.shape, lambda i: (0, 0, 0)))
    if fc_w is not None:
        operands.append(fc_w)
        specs.append(pl.BlockSpec(fc_w.shape, lambda i: (0, 0, 0)))
    operands.append(vecs)
    specs.append(pl.BlockSpec(vecs.shape, lambda i: (0, 0)))

    # ---- advisory cost estimate for the XLA scheduler ----
    flops = 0
    for bidx in range(num_blocks):
        d_in = in_dim if bidx == 0 else out_dim
        flops += 2 * B * d_in * (2 * out_dim)                 # fused up/bypass matmul
        flops += (depth - 1) * 2 * B * out_dim * out_dim      # inner FCs
    bytes_accessed = int(
        x.size * x.dtype.itemsize + B * out_dim * 4
        + sum(int(o.size) * o.dtype.itemsize for o in operands[1:]))
    cost = pl.CostEstimate(flops=int(flops), transcendentals=0,
                           bytes_accessed=bytes_accessed)

    kern = functools.partial(
        _scale_fc_kernel, num_blocks=num_blocks, depth=depth, out_dim=out_dim,
        has_rest=w_rest is not None, has_fc=fc_w is not None)

    return pl.pallas_call(
        kern,
        out_shape=jax.ShapeDtypeStruct((B, out_dim), jnp.float32),
        grid=(B // bm,),
        in_specs=specs,
        out_specs=pl.BlockSpec((bm, out_dim), lambda i: (i, 0)),
        compiler_params=pltpu.CompilerParams(
            dimension_semantics=("parallel",),        # v7x: shard batch across TCs
            vmem_limit_bytes=32 * 1024 * 1024),
        cost_estimate=cost,
    )(*operands)


# ----------------------------------------------------------------------------
# Parameter init (PyTorch-like Linear init; bf16 weights, f32 biases/alphas)
# ----------------------------------------------------------------------------
def _linear(key, fan_in, fan_out):
    k1, k2 = jax.random.split(key)
    bound = 1.0 / np.sqrt(fan_in)
    w = jax.random.uniform(k1, (fan_in, fan_out), jnp.float32, -bound, bound)
    b = jax.random.uniform(k2, (1, fan_out), jnp.float32, -bound, bound)
    return w.astype(jnp.bfloat16), b


def init_params(key, in_dim, out_dim, block_per_scale=1, depth_per_block=2):
    blocks = []
    d_in = in_dim
    for _ in range(block_per_scale):
        key, ku, kb, ka = jax.random.split(key, 4)
        up_w, up_b = _linear(ku, d_in, out_dim)
        fcs = []
        for _ in range(depth_per_block - 1):
            key, kf, kp = jax.random.split(key, 3)
            fc_w, fc_b = _linear(kf, out_dim, out_dim)
            alpha = 0.25 + 0.05 * jax.random.normal(kp, (1, out_dim), jnp.float32)
            fcs.append((fc_w, fc_b, alpha))
        bp_w, bp_b = _linear(kb, d_in, out_dim)
        bp_a = 0.25 + 0.05 * jax.random.normal(ka, (1, out_dim), jnp.float32)
        blocks.append({"up_w": up_w, "up_b": up_b, "fcs": fcs,
                       "bp_w": bp_w, "bp_b": bp_b, "bp_a": bp_a})
        d_in = out_dim
    return {"blocks": blocks, "depth": depth_per_block}


# ----------------------------------------------------------------------------
# Pure-JAX reference (mirrors PyTorch ScaleFCBlock / ResidualFC forward,
# using the same bf16 matmul operands + f32 accumulation as the kernel)
# ----------------------------------------------------------------------------
def _ref_forward(x, params):
    def prelu(v, a):
        return jnp.where(v >= 0, v, a * v)

    def lin(v, w, b):
        return jnp.dot(v.astype(jnp.bfloat16), w,
                       preferred_element_type=jnp.float32) + b

    y = x.astype(jnp.float32)
    for blk in params["blocks"]:
        h = lin(y, blk["up_w"], blk["up_b"])
        for fc_w, fc_b, a in blk["fcs"]:
            h = prelu(h, a)
            h = lin(h, fc_w, fc_b)
        y = prelu(h + lin(y, blk["bp_w"], blk["bp_b"]), blk["bp_a"])
    return y


if __name__ == "__main__":
    B, in_dim, out_dim = 64, 32, 128
    block_per_scale, depth_per_block = 2, 2

    key = jax.random.PRNGKey(0)
    key, kx = jax.random.split(key)
    x = jax.random.normal(kx, (B, in_dim), jnp.float32)
    params = init_params(key, in_dim, out_dim, block_per_scale, depth_per_block)

    out = jax.block_until_ready(scale_fc_forward(x, params))
    ref = jax.block_until_ready(_ref_forward(x, params))

    assert out.shape == (B, out_dim), out.shape
    np.testing.assert_allclose(np.asarray(out), np.asarray(ref), rtol=2e-3, atol=2e-3)

    print("KERNEL_OK")
</pallas_src>

<mosaic_0001>
module attributes {stable_mosaic.version = 11 : i64} {
  func.func @_scale_fc_kernel(%arg0: i32, %arg1: memref<64x32xf32, #tpu.memory_space<vmem>>, %arg2: memref<32x256xbf16, #tpu.memory_space<vmem>>, %arg3: memref<1x128x256xbf16, #tpu.memory_space<vmem>>, %arg4: memref<2x128x128xbf16, #tpu.memory_space<vmem>>, %arg5: memref<10x128xf32, #tpu.memory_space<vmem>>, %arg6: memref<64x128xf32, #tpu.memory_space<vmem>>) attributes {dimension_semantics = [#tpu.dimension_semantics<parallel>], iteration_bounds = array<i64: 1>, scalar_prefetch = 0 : i64, scratch_operands = 0 : i64, tpu.core_type = #tpu.core_type<tc>, window_params = [{transform_indices = @transform_0, window_bounds = array<i64: 64, 32>}, {pipeline_mode = #tpu.pipeline_mode<synchronous>, transform_indices = @transform_1, window_bounds = array<i64: 32, 256>}, {pipeline_mode = #tpu.pipeline_mode<synchronous>, transform_indices = @transform_2, window_bounds = array<i64: 1, 128, 256>}, {pipeline_mode = #tpu.pipeline_mode<synchronous>, transform_indices = @transform_3, window_bounds = array<i64: 2, 128, 128>}, {pipeline_mode = #tpu.pipeline_mode<synchronous>, transform_indices = @transform_4, window_bounds = array<i64: 10, 128>}, {transform_indices = @transform_5, window_bounds = array<i64: 64, 128>}]} {
    %c0 = arith.constant 0 : index
    %c0_0 = arith.constant 0 : index
    %0 = vector.load %arg5[%c0, %c0_0] : memref<10x128xf32, #tpu.memory_space<vmem>>, vector<10x128xf32>
    %c0_1 = arith.constant 0 : index
    %c0_2 = arith.constant 0 : index
    %1 = vector.load %arg1[%c0_1, %c0_2] : memref<64x32xf32, #tpu.memory_space<vmem>>, vector<64x32xf32>
    %c0_3 = arith.constant 0 : index
    %c0_4 = arith.constant 0 : index
    %2 = vector.load %arg2[%c0_3, %c0_4] : memref<32x256xbf16, #tpu.memory_space<vmem>>, vector<32x256xbf16>
    %3 = vector.extract_strided_slice %0 {offsets = [0, 0], sizes = [1, 128], strides = [1, 1]} : vector<10x128xf32> to vector<1x128xf32>
    %4 = vector.extract_strided_slice %0 {offsets = [1, 0], sizes = [1, 128], strides = [1, 1]} : vector<10x128xf32> to vector<1x128xf32>
    %5 = vector.extract_strided_slice %0 {offsets = [2, 0], sizes = [1, 128], strides = [1, 1]} : vector<10x128xf32> to vector<1x128xf32>
    %6 = arith.truncf %1 : vector<64x32xf32> to vector<64x32xbf16>
    %cst = arith.constant dense<0.000000e+00> : vector<64x256xf32>
    %7 = tpu.matmul %6, %2, %cst {dimension_numbers = #tpu.dot_dimension_numbers<[1], [0], [0], [1], [0, 0, 1, 1], [], []>} : vector<64x32xbf16>, vector<32x256xbf16>, vector<64x256xf32> -> vector<64x256xf32>
    %8 = vector.extract_strided_slice %7 {offsets = [0, 0], sizes = [64, 128], strides = [1, 1]} : vector<64x256xf32> to vector<64x128xf32>
    %9 = vector.broadcast %3 : vector<1x128xf32> to vector<64x128xf32>
    %10 = arith.addf %8, %9 : vector<64x128xf32>
    %11 = vector.extract_strided_slice %7 {offsets = [0, 128], sizes = [64, 128], strides = [1, 1]} : vector<64x256xf32> to vector<64x128xf32>
    %12 = vector.broadcast %4 : vector<1x128xf32> to vector<64x128xf32>
    %13 = arith.addf %11, %12 : vector<64x128xf32>
    %14 = vector.extract_strided_slice %0 {offsets = [3, 0], sizes = [1, 128], strides = [1, 1]} : vector<10x128xf32> to vector<1x128xf32>
    %15 = vector.extract_strided_slice %0 {offsets = [4, 0], sizes = [1, 128], strides = [1, 1]} : vector<10x128xf32> to vector<1x128xf32>
    %cst_5 = arith.constant 0.000000e+00 : f32
    %16 = vector.broadcast %cst_5 : f32 to vector<64x128xf32>
    %17 = arith.cmpf oge, %10, %16 : vector<64x128xf32>
    %18 = vector.broadcast %15 : vector<1x128xf32> to vector<64x128xf32>
    %19 = arith.mulf %18, %10 : vector<64x128xf32>
    %20 = arith.select %17, %10, %19 : vector<64x128xi1>, vector<64x128xf32>
    %c0_6 = arith.constant 0 : index
    %c0_7 = arith.constant 0 : index
    %c0_8 = arith.constant 0 : index
    %21 = vector.load %arg4[%c0_6, %c0_7, %c0_8] : memref<2x128x128xbf16, #tpu.memory_space<vmem>>, vector<1x128x128xbf16>
    %22 = vector.shape_cast %21 : vector<1x128x128xbf16> to vector<128x128xbf16>
    %23 = arith.truncf %20 : vector<64x128xf32> to vector<64x128xbf16>
    %cst_9 = arith.constant dense<0.000000e+00> : vector<64x128xf32>
    %24 = tpu.matmul %23, %22, %cst_9 {dimension_numbers = #tpu.dot_dimension_numbers<[1], [0], [0], [1], [0, 0, 1, 1], [], []>} : vector<64x128xbf16>, vector<128x128xbf16>, vector<64x128xf32> -> vector<64x128xf32>
    %25 = vector.broadcast %14 : vector<1x128xf32> to vector<64x128xf32>
    %26 = arith.addf %24, %25 : vector<64x128xf32>
    %27 = arith.addf %26, %13 : vector<64x128xf32>
    %cst_10 = arith.constant 0.000000e+00 : f32
    %28 = vector.broadcast %cst_10 : f32 to vector<64x128xf32>
    %29 = arith.cmpf oge, %27, %28 : vector<64x128xf32>
    %30 = vector.broadcast %5 : vector<1x128xf32> to vector<64x128xf32>
    %31 = arith.mulf %30, %27 : vector<64x128xf32>
    %32 = arith.select %29, %27, %31 : vector<64x128xi1>, vector<64x128xf32>
    %c0_11 = arith.constant 0 : index
    %c0_12 = arith.constant 0 : index
    %c0_13 = arith.constant 0 : index
    %33 = vector.load %arg3[%c0_11, %c0_12, %c0_13] : memref<1x128x256xbf16, #tpu.memory_space<vmem>>, vector<1x128x256xbf16>
    %34 = vector.shape_cast %33 : vector<1x128x256xbf16> to vector<128x256xbf16>
    %35 = vector.extract_strided_slice %0 {offsets = [5, 0], sizes = [1, 128], strides = [1, 1]} : vector<10x128xf32> to vector<1x128xf32>
    %36 = vector.extract_strided_slice %0 {offsets = [6, 0], sizes = [1, 128], strides = [1, 1]} : vector<10x128xf32> to vector<1x128xf32>
    %37 = vector.extract_strided_slice %0 {offsets = [7, 0], sizes = [1, 128], strides = [1, 1]} : vector<10x128xf32> to vector<1x128xf32>
    %38 = arith.truncf %32 : vector<64x128xf32> to vector<64x128xbf16>
    %cst_14 = arith.constant dense<0.000000e+00> : vector<64x256xf32>
    %39 = tpu.matmul %38, %34, %cst_14 {dimension_numbers = #tpu.dot_dimension_numbers<[1], [0], [0], [1], [0, 0, 1, 1], [], []>} : vector<64x128xbf16>, vector<128x256xbf16>, vector<64x256xf32> -> vector<64x256xf32>
    %40 = vector.extract_strided_slice %39 {offsets = [0, 0], sizes = [64, 128], strides = [1, 1]} : vector<64x256xf32> to vector<64x128xf32>
    %41 = vector.broadcast %35 : vector<1x128xf32> to vector<64x128xf32>
    %42 = arith.addf %40, %41 : vector<64x128xf32>
    %43 = vector.extract_strided_slice %39 {offsets = [0, 128], sizes = [64, 128], strides = [1, 1]} : vector<64x256xf32> to vector<64x128xf32>
    %44 = vector.broadcast %36 : vector<1x128xf32> to vector<64x128xf32>
    %45 = arith.addf %43, %44 : vector<64x128xf32>
    %46 = vector.extract_strided_slice %0 {offsets = [8, 0], sizes = [1, 128], strides = [1, 1]} : vector<10x128xf32> to vector<1x128xf32>
    %47 = vector.extract_strided_slice %0 {offsets = [9, 0], sizes = [1, 128], strides = [1, 1]} : vector<10x128xf32> to vector<1x128xf32>
    %cst_15 = arith.constant 0.000000e+00 : f32
    %48 = vector.broadcast %cst_15 : f32 to vector<64x128xf32>
    %49 = arith.cmpf oge, %42, %48 : vector<64x128xf32>
    %50 = vector.broadcast %47 : vector<1x128xf32> to vector<64x128xf32>
    %51 = arith.mulf %50, %42 : vector<64x128xf32>
    %52 = arith.select %49, %42, %51 : vector<64x128xi1>, vector<64x128xf32>
    %c1 = arith.constant 1 : index
    %c0_16 = arith.constant 0 : index
    %c0_17 = arith.constant 0 : index
    %53 = vector.load %arg4[%c1, %c0_16, %c0_17] : memref<2x128x128xbf16, #tpu.memory_space<vmem>>, vector<1x128x128xbf16>
    %54 = vector.shape_cast %53 : vector<1x128x128xbf16> to vector<128x128xbf16>
    %55 = arith.truncf %52 : vector<64x128xf32> to vector<64x128xbf16>
    %cst_18 = arith.constant dense<0.000000e+00> : vector<64x128xf32>
    %56 = tpu.matmul %55, %54, %cst_18 {dimension_numbers = #tpu.dot_dimension_numbers<[1], [0], [0], [1], [0, 0, 1, 1], [], []>} : vector<64x128xbf16>, vector<128x128xbf16>, vector<64x128xf32> -> vector<64x128xf32>
    %57 = vector.broadcast %46 : vector<1x128xf32> to vector<64x128xf32>
    %58 = arith.addf %56, %57 : vector<64x128xf32>
    %59 = arith.addf %58, %45 : vector<64x128xf32>
    %cst_19 = arith.constant 0.000000e+00 : f32
    %60 = vector.broadcast %cst_19 : f32 to vector<64x128xf32>
    %61 = arith.cmpf oge, %59, %60 : vector<64x128xf32>
    %62 = vector.broadcast %37 : vector<1x128xf32> to vector<64x128xf32>
    %63 = arith.mulf %62, %59 : vector<64x128xf32>
    %64 = arith.select %61, %59, %63 : vector<64x128xi1>, vector<64x128xf32>
    %c0_20 = arith.constant 0 : index
    %c0_21 = arith.constant 0 : index
    %65 = vector.load %arg6[%c0_20, %c0_21] : memref<64x128xf32, #tpu.memory_space<vmem>>, vector<64x128xf32>
    tpu.vector_store %arg6[%c0_20, %c0_21], %64 {strides = array<i32>} : memref<64x128xf32, #tpu.memory_space<vmem>>, vector<64x128xf32>,
    return
  }
  func.func @transform_0(%arg0: i32) -> (i32, i32) {
    %c0_i32 = arith.constant 0 : i32
    %c0_i32_0 = arith.constant 0 : i32
    return %arg0, %c0_i32 : i32, i32
  }
  func.func @transform_1(%arg0: i32) -> (i32, i32) {
    %c0_i32 = arith.constant 0 : i32
    %c0_i32_0 = arith.constant 0 : i32
    %c0_i32_1 = arith.constant 0 : i32
    return %c0_i32, %c0_i32_0 : i32, i32
  }
  func.func @transform_2(%arg0: i32) -> (i32, i32, i32) {
    %c0_i32 = arith.constant 0 : i32
    %c0_i32_0 = arith.constant 0 : i32
    %c0_i32_1 = arith.constant 0 : i32
    %c0_i32_2 = arith.constant 0 : i32
    return %c0_i32, %c0_i32_0, %c0_i32_1 : i32, i32, i32
  }
  func.func @transform_3(%arg0: i32) -> (i32, i32, i32) {
    %c0_i32 = arith.constant 0 : i32
    %c0_i32_0 = arith.constant 0 : i32
    %c0_i32_1 = arith.constant 0 : i32
    %c0_i32_2 = arith.constant 0 : i32
    return %c0_i32, %c0_i32_0, %c0_i32_1 : i32, i32, i32
  }
  func.func @transform_4(%arg0: i32) -> (i32, i32) {
    %c0_i32 = arith.constant 0 : i32
    %c0_i32_0 = arith.constant 0 : i32
    %c0_i32_1 = arith.constant 0 : i32
    return %c0_i32, %c0_i32_0 : i32, i32
  }
  func.func @transform_5(%arg0: i32) -> (i32, i32) {
    %c0_i32 = arith.constant 0 : i32
    %c0_i32_0 = arith.constant 0 : i32
    return %arg0, %c0_i32 : i32, i32
  }
}

</mosaic_0001>

<bundles_post_ra>
// kernel: tpu_custom_call.1
= control target key start
LH: loop header
LB: loop body
LE: loop exit
PB: predicated region body
PF: predicated region fallthrough
CT: control target
= control target key end

     0   :  { %10 = vsyncpa [#allocation3], 0  ;;  %s1159_s0 = inlined_call_operand.vmem [shape: f32[64,32], index: 0, kind: input, shape index: {}]   ;;  %s1160_s1 = inlined_call_operand.vmem [shape: bf16[32,256], index: 1, kind: input, shape index: {}]   ;;  %s1161_s2 = inlined_call_operand.hbm [shape: bf16[1,128,256], index: 2, kind: input, shape index: {}]   ;;  %s1162_s3 = inlined_call_operand.hbm [shape: bf16[2,128,128], index: 3, kind: input, shape index: {}]   ;;  %s1163_s4 = inlined_call_operand.vmem [shape: f32[10,128], index: 4, kind: input, shape index: {}]   ;;  %s1164_s5 = inlined_call_operand.hbm [shape: f32[64,128], index: 5, kind: output, shape index: {}]  }
   0x1   :  { %11 = vsyncpa [#allocation6], 0 }
   0x2   :  { %12 = vsyncpa [#allocation4], 0  ;;  %s21_s20 = sshll.u32 %s1161_s2, 4  ;;  %s975_s21 = smov [#allocation2]   ;;  %s22_s20 = int_to_ptr.hbm [resolvable:$true] %s21_s20 }
   0x3   :  { %s23_s22 = sshll.u32 %s975_s21, 4  ;;  %s34_s25 = sshll.u32 %s1162_s3, 4  ;;  %s24_s22 = int_to_ptr.vmem [resolvable:$true] %s23_s22  ;;  %s35_s25 = int_to_ptr.hbm [resolvable:$true] %s34_s25 }
   0x4   :  { %s976_s26 = smov 128   ;;  %s977_s27 = smov 8  }
   0x5   :  { %29 = dma.hbm_to_vmem [thread:$0]  %s22_s20, 2048, %s24_s22, [#allocation3], %s976_s26, %s976_s26, %s977_s27  }
   0x6   :  { %s978_s28 = smov [#allocation5]   ;;  %s979_s30 = smov 64  }
   0x7   :  { %s36_s29 = sshll.u32 %s978_s28, 4  ;;  %s980_s2 = smov 4   ;;  %s37_s29 = int_to_ptr.vmem [resolvable:$true] %s36_s29 }
   0x8   :  { %42 = dma.hbm_to_vmem [thread:$0]  %s35_s25, 2048, %s37_s29, [#allocation6], %s979_s30, %s979_s30, %s980_s2  }
   0x9   :  { %969 = dma.done.wait [#allocation3], 2048  }
   0xa   :  { %970 = vsyncadd [#allocation3], 4294965248 }
   0xb   :  { %971 = dma.done.wait [#allocation6], 2048  }
   0xc   :  { %972 = vsyncadd [#allocation6], 4294965248  ;;  %v708_v0 = vld [vmem:[%s1160_s1 + $0x10] sm:$0xf]  ;;  %v853_v1 = vld [vmem:[%s1160_s1 + $0x14] sm:$0xf0] }
   0xd   :  { %v700_v2 = vld [vmem:[%s1160_s1] sm:$0xf]  ;;  %v709_v3 = vor.u32 %v853_v1, %v708_v0  ;;  %v851_v4 = vld [vmem:[%s1160_s1 + $0x4] sm:$0xf0]  ;;  %v861_v10 = vld [vmem:[#allocation5 + $0x38] sm:$0xff]  ;;  %vm92_vm0 = vcmask 261120  }
   0xe   :  { %v56_v5 = vld [vmem:[%s1159_s0] sm:$0xff]  ;;  %v701_v6 = vor.u32 %v851_v4, %v700_v2  ;;  %v57_v7 = vld [vmem:[%s1159_s0 + $0x8] sm:$0xff]  ;;  %v860_v13 = vld [vmem:[#allocation5 + $0x30] sm:$0xff]  ;;  %s684_s17 = sshll.u32 %s1164_s5, 4  ;;  %s685_s17 = int_to_ptr.hbm [resolvable:$true] %s684_s17 }
   0xf   :  { %111 = vmatpush.bf16.msra.mxu0 %v709_v3  ;;  %886 = vmatpush.bf16.msra.mxu2 %v709_v3  ;;  %v60_v8 = vld [vmem:[%s1159_s0 + $0x20] sm:$0xff]  ;;  %v61_v9 = vld [vmem:[%s1159_s0 + $0x28] sm:$0xff]  ;;  %v68_v11 = vpack.c.bf16 %v57_v7, %v56_v5  ;;  %v58_v16 = vld [vmem:[%s1159_s0 + $0x10] sm:$0xff] }
  0x10   :  { %v70_v12 = vpack.c.bf16 %v61_v9, %v60_v8  ;;  %v859_v14 = vld [vmem:[#allocation5 + $0x28] sm:$0xff]  ;;  %v858_v15 = vld [vmem:[#allocation5 + $0x20] sm:$0xff]  ;;  %v59_v17 = vld [vmem:[%s1159_s0 + $0x18] sm:$0xff] }
  0x11   :  { %v62_v18 = vld [vmem:[%s1159_s0 + $0x30] sm:$0xff]  ;;  %v63_v19 = vld [vmem:[%s1159_s0 + $0x38] sm:$0xff]  ;;  %v69_v20 = vpack.c.bf16 %v59_v17, %v58_v16  ;;  %v855_v27 = vld [vmem:[#allocation5 + $0x8] sm:$0xff] }
  0x12   :  { %v71_v21 = vpack.c.bf16 %v63_v19, %v62_v18  ;;  %v857_v22 = vld [vmem:[#allocation5 + $0x18] sm:$0xff]  ;;  %v856_v23 = vld [vmem:[#allocation5 + $0x10] sm:$0xff]  ;;  %v850_v28 = vld [vmem:[%s1160_s1 + $0x4] sm:$0xf] }
  0x13   :  { %112 = vmatpush.bf16.msra.mxu0 %v701_v6  ;;  %887 = vmatpush.bf16.msra.mxu2 %v701_v6  ;;  %v852_v24 = vld [vmem:[%s1160_s1 + $0x14] sm:$0xf]  ;;  %v710_v25 = vld [vmem:[%s1160_s1 + $0x18] sm:$0xf0]  ;;  %v702_v29 = vld [vmem:[%s1160_s1 + $0x8] sm:$0xf0] }
  0x14   :  { %v713_v26 = vor.u32 %v852_v24, %v710_v25  ;;  %v705_v30 = vor.u32 %v850_v28, %v702_v29  ;;  %v854_v31 = vld [vmem:[#allocation5] sm:$0xff]  ;;  %v812_v55 = vld [vmem:[#allocation2 + $0x70] sm:$0xf]  ;;  %v877_v56 = vld [vmem:[#allocation2 + $0x74] sm:$0xf0] }
  0x15   :  { %v1078_v32 = vld [vmem:[%s1163_s4] sm:$0xff]  ;;  %v876_v57 = vld [vmem:[#allocation2 + $0x74] sm:$0xf]  ;;  %v813_v58 = vor.u32 %v877_v56, %v812_v55  ;;  %v814_v59 = vld [vmem:[#allocation2 + $0x78] sm:$0xf0] }
  0x16   :  { %714 = vmatmul.msk.bf16.vlgmr.msra.gmra.mxu0 %vm92_vm0, %v68_v11  ;;  %716 = vmatmul.msk.bf16.vlgmr.msra.gmra.mxu2 %vm92_vm0, %v70_v12  ;;  %v163_v34 = vperm.slane %v1078_v32, 0  ;;  %v189_v36 = vperm.slane %v1078_v32, 4  ;;  %v804_v60 = vld [vmem:[#allocation2 + $0x60] sm:$0xf]  ;;  %v817_v61 = vor.u32 %v876_v57, %v814_v59  ;;  %v875_v62 = vld [vmem:[#allocation2 + $0x64] sm:$0xf0] }
  0x17   :  { %275 = vmatpush.bf16.msrb.mxu2 %v861_v10  ;;  %140 = vmatpush.bf16.msra.mxu1 %v713_v26  ;;  %v874_v63 = vld [vmem:[#allocation2 + $0x64] sm:$0xf]  ;;  %v806_v0 = vld [vmem:[#allocation2 + $0x68] sm:$0xf0]  ;;  %v805_v3 = vor.u32 %v875_v62, %v804_v60  ;;  %v796_v19 = vld [vmem:[#allocation2 + $0x50] sm:$0xf] }
  0x18   :  { %888 = vmatpush.bf16.msra.mxu3 %v713_v26  ;;  %466 = vmatpush.bf16.msrb.mxu0 %v817_v61  ;;  %v809_v4 = vor.u32 %v874_v63, %v806_v0  ;;  %v788_v24 = vld [vmem:[#allocation2 + $0x40] sm:$0xf]  ;;  %v871_v25 = vld [vmem:[#allocation2 + $0x44] sm:$0xf0]  ;;  %v790_v28 = vld [vmem:[#allocation2 + $0x48] sm:$0xf0] }
  0x19   :  { %v789_v29 = vor.u32 %v871_v25, %v788_v24  ;;  %v1085_v57 = vperm.slane %v1078_v32, 1  ;;  %v1093_v0 = vperm.slane %v1078_v32, 2 }
  0x1b   :  { %276 = vmatpush.bf16.msrb.mxu2 %v860_v13  ;;  %141 = vmatpush.bf16.msra.mxu1 %v705_v30 }
  0x1c   :  { %889 = vmatpush.bf16.msra.mxu3 %v705_v30  ;;  %467 = vmatpush.bf16.msrb.mxu0 %v809_v4 }
  0x1e   :  { %718 = vmatmul.msk.bf16.vlgmr.msra.gmra.mxu1 %vm92_vm0, %v68_v11 }
  0x1f   :  { %277 = vmatpush.bf16.msrb.mxu2 %v859_v14  ;;  %720 = vmatmul.msk.bf16.vlgmr.msra.gmra.mxu3 %vm92_vm0, %v70_v12 }
  0x20   :  { %437 = vmatpush.bf16.msrb.mxu3 %v813_v58  ;;  %v1088_v58 = vperm.slane %v1078_v32, 3 }
  0x23   :  { %278 = vmatpush.bf16.msrb.mxu2 %v858_v15 }
  0x24   :  { %438 = vmatpush.bf16.msrb.mxu3 %v805_v3 }
  0x26   :  { %715 = vmatmul.msk.bf16.gmra.mxu0 %vm92_vm0, %v69_v20  ;;  %717 = vmatmul.msk.bf16.gmra.mxu2 %vm92_vm0, %v71_v21 }
  0x27   :  { %279 = vmatpush.bf16.msrb.mxu2 %v857_v22 }
  0x2b   :  { %280 = vmatpush.bf16.msrb.mxu2 %v856_v23  ;;  %v798_v23 = vld [vmem:[#allocation2 + $0x58] sm:$0xf0] }
  0x2e   :  { %719 = vmatmul.msk.bf16.gmra.mxu1 %vm92_vm0, %v69_v20  ;;  %v873_v20 = vld [vmem:[#allocation2 + $0x54] sm:$0xf0] }
  0x2f   :  { %281 = vmatpush.bf16.msrb.mxu2 %v855_v27  ;;  %721 = vmatmul.msk.bf16.gmra.mxu3 %vm92_vm0, %v71_v21  ;;  %v872_v21 = vld [vmem:[#allocation2 + $0x54] sm:$0xf]  ;;  %v797_v22 = vor.u32 %v873_v20, %v796_v19  ;;  %v870_v27 = vld [vmem:[#allocation2 + $0x44] sm:$0xf] }
  0x30   :  { %v801_v26 = vor.u32 %v872_v21, %v798_v23  ;;  %v793_v30 = vor.u32 %v870_v27, %v790_v28  ;;  %v885_v28 = vld [vmem:[#allocation5 + $0x78] sm:$0xff] }
  0x31   :  { %439 = vmatpush.bf16.msrb.mxu3 %v797_v22  ;;  %608 = vmatpush.bf16.msrb.mxu1 %v885_v28 }
  0x32   :  { %468 = vmatpush.bf16.msrb.mxu0 %v801_v26 }
  0x33   :  { %282 = vmatpush.bf16.msrb.mxu2 %v854_v31  ;;  %v780_v31 = vld [vmem:[#allocation2 + $0x30] sm:$0xf] }
  0x35   :  { %440 = vmatpush.bf16.msrb.mxu3 %v789_v29 }
  0x36   :  { %469 = vmatpush.bf16.msrb.mxu0 %v793_v30 }
  0x93   :  { %v114_v33 = vpop.f32.mrf.mxu0 }
  0x94   :  { %v164_v35 = vadd.f32 %v163_v34, %v114_v33  ;;  %v869_v33 = vld [vmem:[#allocation2 + $0x34] sm:$0xf0] }
  0x96   :  { %v190_v38 = vmul.f32 %v189_v36, %v164_v35  ;;  %vm181_vm1 = vcmp.ge.f32.partialorder %v164_v35, 0.0 }
  0x98   :  { %v198_v41 = vsel %vm181_vm1, %v164_v35, %v190_v38  ;;  %v781_v35 = vor.u32 %v869_v33, %v780_v31  ;;  %v772_v38 = vld [vmem:[#allocation2 + $0x20] sm:$0xf]  ;;  %v884_v31 = vld [vmem:[#allocation5 + $0x70] sm:$0xff] }
  0x99   :  { %v124_v45 = vpop.f32.mrf.mxu2  ;;  %609 = vmatpush.bf16.msrb.mxu1 %v884_v31 }
  0x9a   :  { %v168_v1 = vadd.f32 %v163_v34, %v124_v45  ;;  %441 = vmatpush.bf16.msrb.mxu3 %v781_v35  ;;  %v865_v45 = vld [vmem:[#allocation2 + $0x14] sm:$0xf0]  ;;  %v883_v35 = vld [vmem:[#allocation5 + $0x68] sm:$0xff] }
  0x9b   :  { %v116_v37 = vpop.f32.mrf.mxu0  ;;  %v143_v56 = vpop.f32.mrf.mxu1 }
  0x9c   :  { %v165_v39 = vadd.f32 %v163_v34, %v116_v37  ;;  %v194_v6 = vmul.f32 %v189_v36, %v168_v1  ;;  %vm185_vm5 = vcmp.ge.f32.partialorder %v168_v1, 0.0  ;;  %v173_v61 = vadd.f32 %v1085_v57, %v143_v56 }
  0x9d   :  { %610 = vmatpush.bf16.msrb.mxu1 %v883_v35 }
  0x9e   :  { %vm182_vm2 = vcmp.ge.f32.partialorder %v165_v39, 0.0  ;;  %v191_v40 = vmul.f32 %v189_v36, %v165_v39  ;;  %v202_v8 = vsel %vm185_vm5, %v168_v1, %v194_v6 }
  0xa0   :  { %v199_v42 = vsel %vm182_vm2, %v165_v39, %v191_v40  ;;  %v867_v39 = vld [vmem:[#allocation2 + $0x24] sm:$0xf0]  ;;  %v866_v40 = vld [vmem:[#allocation2 + $0x24] sm:$0xf] }
  0xa1   :  { %v222_v43 = vpack.c.bf16 %v199_v42, %v198_v41  ;;  %v126_v51 = vpop.f32.mrf.mxu2  ;;  %v773_v41 = vor.u32 %v867_v39, %v772_v38  ;;  %v774_v42 = vld [vmem:[#allocation2 + $0x28] sm:$0xf0] }
  0xa2   :  { %v169_v2 = vadd.f32 %v163_v34, %v126_v51  ;;  %v863_v51 = vld [vmem:[#allocation2 + $0x4] sm:$0xf0] }
  0xa3   :  { %v119_v44 = vpop.f32.mrf.mxu0  ;;  %283 = vmatmul.bf16.vlgmr.msrb.gmra.mxu2 %v222_v43  ;;  %v777_v43 = vor.u32 %v866_v40, %v774_v42  ;;  %442 = vmatpush.bf16.msrb.mxu3 %v773_v41  ;;  %v145_v60 = vpop.f32.mrf.mxu1 }
  0xa4   :  { %v166_v46 = vadd.f32 %v163_v34, %v119_v44  ;;  %v195_v7 = vmul.f32 %v189_v36, %v169_v2  ;;  %vm186_vm6 = vcmp.ge.f32.partialorder %v169_v2, 0.0  ;;  %v764_v44 = vld [vmem:[#allocation2 + $0x10] sm:$0xf] }
  0xa6   :  { %v192_v48 = vmul.f32 %v189_v36, %v166_v46  ;;  %vm183_vm3 = vcmp.ge.f32.partialorder %v166_v46, 0.0  ;;  %v203_v9 = vsel %vm186_vm6, %v169_v2, %v195_v7  ;;  %v174_v2 = vadd.f32 %v1085_v57, %v145_v60 }
  0xa7   :  { %v224_v10 = vpack.c.bf16 %v203_v9, %v202_v8 }
  0xa8   :  { %v200_v52 = vsel %vm183_vm3, %v166_v46, %v192_v48  ;;  %v864_v46 = vld [vmem:[#allocation2 + $0x14] sm:$0xf]  ;;  %v766_v48 = vld [vmem:[#allocation2 + $0x18] sm:$0xf0] }
  0xa9   :  { %v129_v5 = vpop.f32.mrf.mxu2 }
  0xaa   :  { %v170_v12 = vadd.f32 %v163_v34, %v129_v5 }
  0xab   :  { %v121_v47 = vpop.f32.mrf.mxu0  ;;  %v148_v6 = vpop.f32.mrf.mxu1 }
  0xac   :  { %v167_v49 = vadd.f32 %v163_v34, %v121_v47  ;;  %v196_v14 = vmul.f32 %v189_v36, %v170_v12  ;;  %vm187_vm7 = vcmp.ge.f32.partialorder %v170_v12, 0.0  ;;  %v765_v47 = vor.u32 %v865_v45, %v764_v44 }
  0xae   :  { %v193_v50 = vmul.f32 %v189_v36, %v167_v49  ;;  %vm184_vm4 = vcmp.ge.f32.partialorder %v167_v49, 0.0  ;;  %v204_v16 = vsel %vm187_vm7, %v170_v12, %v196_v14  ;;  %443 = vmatpush.bf16.msrb.mxu3 %v765_v47  ;;  %v175_v12 = vadd.f32 %v1085_v57, %v148_v6 }
  0xb0   :  { %v201_v53 = vsel %vm184_vm4, %v167_v49, %v193_v50  ;;  %v769_v49 = vor.u32 %v864_v46, %v766_v48  ;;  %v756_v50 = vld [vmem:[#allocation2] sm:$0xf] }
  0xb1   :  { %v223_v54 = vpack.c.bf16 %v201_v53, %v200_v52  ;;  %v131_v11 = vpop.f32.mrf.mxu2  ;;  %v862_v52 = vld [vmem:[#allocation2 + $0x4] sm:$0xf]  ;;  %v757_v53 = vor.u32 %v863_v51, %v756_v50 }
  0xb2   :  { %v171_v13 = vadd.f32 %v163_v34, %v131_v11  ;;  %v868_v34 = vld [vmem:[#allocation2 + $0x34] sm:$0xf] }
  0xb3   :  { %288 = vmatmul.bf16.gmra.mxu2 %v223_v54  ;;  %v758_v54 = vld [vmem:[#allocation2 + $0x8] sm:$0xf0]  ;;  %444 = vmatpush.bf16.msrb.mxu3 %v757_v53  ;;  %v150_v14 = vpop.f32.mrf.mxu1 }
  0xb4   :  { %v197_v15 = vmul.f32 %v189_v36, %v171_v13  ;;  %vm188_vm8 = vcmp.ge.f32.partialorder %v171_v13, 0.0  ;;  %v782_v36 = vld [vmem:[#allocation2 + $0x38] sm:$0xf0]  ;;  %v761_v55 = vor.u32 %v862_v52, %v758_v54 }
  0xb5   :  { %v785_v37 = vor.u32 %v868_v34, %v782_v36 }
  0xb6   :  { %v205_v17 = vsel %vm188_vm8, %v171_v13, %v197_v15 }
  0xb7   :  { %v225_v18 = vpack.c.bf16 %v205_v17, %v204_v16  ;;  %470 = vmatpush.bf16.msrb.mxu0 %v785_v37  ;;  %v153_v16 = vpop.f32.mrf.mxu3 }
  0xb8   :  { %v177_v29 = vadd.f32 %v1085_v57, %v153_v16 }
  0xbb   :  { %471 = vmatpush.bf16.msrb.mxu0 %v777_v43 }
  0xbf   :  { %472 = vmatpush.bf16.msrb.mxu0 %v769_v49  ;;  %v155_v27 = vpop.f32.mrf.mxu3 }
  0xc0   :  { %v178_v36 = vadd.f32 %v1085_v57, %v155_v27 }
  0xc3   :  { %293 = vmatmul.bf16.gmra.mxu2 %v224_v10  ;;  %473 = vmatpush.bf16.msrb.mxu0 %v761_v55 }
  0xc7   :  { %v158_v40 = vpop.f32.mrf.mxu3 }
  0xc8   :  { %v179_v46 = vadd.f32 %v1085_v57, %v158_v40 }
  0xcf   :  { %v160_v48 = vpop.f32.mrf.mxu3 }
  0xd0   :  { %v180_v51 = vadd.f32 %v1085_v57, %v160_v48 }
  0xd3   :  { %298 = vmatmul.bf16.gmra.mxu2 %v225_v18  ;;  %v176_v18 = vadd.f32 %v1085_v57, %v150_v14  ;;  %v879_v57 = vld [vmem:[#allocation5 + $0x48] sm:$0xff] }
 0x126   :  { %v284_v59 = vpop.f32.mrf.mxu2 }
 0x127   :  { %v285_v62 = vadd.f32 %v284_v59, %v1088_v58 }
 0x129   :  { %v304_v63 = vadd.f32 %v285_v62, %v173_v61  ;;  %v882_v61 = vld [vmem:[#allocation5 + $0x60] sm:$0xff]  ;;  %v881_v62 = vld [vmem:[#allocation5 + $0x58] sm:$0xff] }
 0x12a   :  { %611 = vmatpush.bf16.msrb.mxu1 %v882_v61 }
 0x12b   :  { %v321_v4 = vmul.f32 %v1093_v0, %v304_v63  ;;  %vm312_vm9 = vcmp.ge.f32.partialorder %v304_v63, 0.0 }
 0x12d   :  { %v329_v8 = vsel %vm312_vm9, %v304_v63, %v321_v4  ;;  %v880_v63 = vld [vmem:[#allocation5 + $0x50] sm:$0xff] }
 0x12e   :  { %v286_v1 = vpop.f32.mrf.mxu2  ;;  %612 = vmatpush.bf16.msrb.mxu1 %v881_v62 }
 0x12f   :  { %v287_v3 = vadd.f32 %v286_v1, %v1088_v58 }
 0x131   :  { %v305_v5 = vadd.f32 %v287_v3, %v174_v2  ;;  %v495_v2 = vperm.slane %v1078_v32, 5 }
 0x132   :  { %613 = vmatpush.bf16.msrb.mxu1 %v880_v63 }
 0x133   :  { %vm313_vm10 = vcmp.ge.f32.partialorder %v305_v5, 0.0  ;;  %v322_v7 = vmul.f32 %v1093_v0, %v305_v5 }
 0x135   :  { %v330_v9 = vsel %vm313_vm10, %v305_v5, %v322_v7 }
 0x136   :  { %v289_v10 = vpop.f32.mrf.mxu2  ;;  %v353_v11 = vpack.c.bf16 %v330_v9, %v329_v8  ;;  %614 = vmatpush.bf16.msrb.mxu1 %v879_v57 }
 0x137   :  { %v290_v13 = vadd.f32 %v289_v10, %v1088_v58 }
 0x138   :  { %445 = vmatmul.bf16.vlgmr.msrb.gmra.mxu3 %v353_v11  ;;  %474 = vmatmul.bf16.vlgmr.msrb.gmra.mxu0 %v353_v11 }
 0x139   :  { %v306_v15 = vadd.f32 %v290_v13, %v175_v12 }
 0x13b   :  { %v323_v21 = vmul.f32 %v1093_v0, %v306_v15  ;;  %vm314_vm11 = vcmp.ge.f32.partialorder %v306_v15, 0.0 }
 0x13d   :  { %v331_v23 = vsel %vm314_vm11, %v306_v15, %v323_v21 }
 0x13e   :  { %v291_v17 = vpop.f32.mrf.mxu2 }
 0x13f   :  { %v292_v19 = vadd.f32 %v291_v17, %v1088_v58 }
 0x141   :  { %v307_v20 = vadd.f32 %v292_v19, %v176_v18 }
 0x143   :  { %vm315_vm12 = vcmp.ge.f32.partialorder %v307_v20, 0.0  ;;  %v324_v22 = vmul.f32 %v1093_v0, %v307_v20 }
 0x145   :  { %v332_v24 = vsel %vm315_vm12, %v307_v20, %v324_v22 }
 0x146   :  { %v294_v25 = vpop.f32.mrf.mxu2  ;;  %v354_v26 = vpack.c.bf16 %v332_v24, %v331_v23 }
 0x147   :  { %v295_v30 = vadd.f32 %v294_v25, %v1088_v58 }
 0x148   :  { %450 = vmatmul.bf16.gmra.mxu3 %v354_v26  ;;  %479 = vmatmul.bf16.gmra.mxu0 %v354_v26 }
 0x149   :  { %v308_v33 = vadd.f32 %v295_v30, %v177_v29 }
 0x14b   :  { %v325_v39 = vmul.f32 %v1093_v0, %v308_v33  ;;  %vm316_vm13 = vcmp.ge.f32.partialorder %v308_v33, 0.0 }
 0x14d   :  { %v333_v42 = vsel %vm316_vm13, %v308_v33, %v325_v39 }
 0x14e   :  { %v296_v34 = vpop.f32.mrf.mxu2 }
 0x14f   :  { %v297_v37 = vadd.f32 %v296_v34, %v1088_v58 }
 0x151   :  { %v309_v38 = vadd.f32 %v297_v37, %v178_v36 }
 0x153   :  { %vm317_vm14 = vcmp.ge.f32.partialorder %v309_v38, 0.0  ;;  %v326_v41 = vmul.f32 %v1093_v0, %v309_v38 }
 0x155   :  { %v334_v43 = vsel %vm317_vm14, %v309_v38, %v326_v41 }
 0x156   :  { %v299_v44 = vpop.f32.mrf.mxu2  ;;  %v355_v45 = vpack.c.bf16 %v334_v43, %v333_v42  ;;  %v1122_v42 = vperm.slane %v1078_v32, 6 }
 0x157   :  { %v300_v47 = vadd.f32 %v299_v44, %v1088_v58 }
 0x158   :  { %455 = vmatmul.bf16.gmra.mxu3 %v355_v45  ;;  %484 = vmatmul.bf16.gmra.mxu0 %v355_v45 }
 0x159   :  { %v310_v49 = vadd.f32 %v300_v47, %v179_v46  ;;  %v1129_v47 = vperm.slane %v1078_v32, 7 }
 0x15b   :  { %v327_v54 = vmul.f32 %v1093_v0, %v310_v49  ;;  %vm318_vm15 = vcmp.ge.f32.partialorder %v310_v49, 0.0 }
 0x15d   :  { %v335_v56 = vsel %vm318_vm15, %v310_v49, %v327_v54 }
 0x15e   :  { %v301_v50 = vpop.f32.mrf.mxu2 }
 0x15f   :  { %v302_v52 = vadd.f32 %v301_v50, %v1088_v58  ;;  %v878_v58 = vld [vmem:[#allocation5 + $0x40] sm:$0xff] }
 0x160   :  { %615 = vmatpush.bf16.msrb.mxu1 %v878_v58 }
 0x161   :  { %v311_v53 = vadd.f32 %v302_v52, %v180_v51 }
 0x163   :  { %vm319_vm0 = vcmp.ge.f32.partialorder %v311_v53, 0.0  ;;  %v328_v55 = vmul.f32 %v1093_v0, %v311_v53  ;;  %v55_v0 = vld [vmem:[%s1163_s4 + $0x8] sm:$0x3]  ;;  %s981_s4 = smov [#allocation7]  }
 0x164   :  { %v521_v4 = vperm.slane %v55_v0, 1  ;;  %v1124_v43 = vperm.slane %v55_v0, 0  ;;  %s682_s14 = sshll.u32 %s981_s4, 4  ;;  %s683_s14 = int_to_ptr.vmem [resolvable:$true] %s682_s14 }
 0x165   :  { %v336_v59 = vsel %vm319_vm0, %v311_v53, %v328_v55 }
 0x166   :  { %v356_v60 = vpack.c.bf16 %v336_v59, %v335_v56 }
 0x168   :  { %460 = vmatmul.bf16.gmra.mxu3 %v356_v60  ;;  %489 = vmatmul.bf16.gmra.mxu0 %v356_v60 }
 0x1b5   :  { %v475_v40 = vpop.f32.mrf.mxu0 }
 0x1b6   :  { %v505_v45 = vadd.f32 %v1122_v42, %v475_v40 }
 0x1bb   :  { %v446_v1 = vpop.f32.mrf.mxu3 }
 0x1bc   :  { %v496_v3 = vadd.f32 %v495_v2, %v446_v1 }
 0x1bd   :  { %v477_v41 = vpop.f32.mrf.mxu0 }
 0x1be   :  { %v522_v6 = vmul.f32 %v521_v4, %v496_v3  ;;  %vm513_vm1 = vcmp.ge.f32.partialorder %v496_v3, 0.0  ;;  %v506_v53 = vadd.f32 %v1122_v42, %v477_v41 }
 0x1c0   :  { %v530_v9 = vsel %vm513_vm1, %v496_v3, %v522_v6 }
 0x1c3   :  { %v448_v5 = vpop.f32.mrf.mxu3 }
 0x1c4   :  { %v497_v7 = vadd.f32 %v495_v2, %v448_v5 }
 0x1c5   :  { %v480_v49 = vpop.f32.mrf.mxu0 }
 0x1c6   :  { %vm514_vm2 = vcmp.ge.f32.partialorder %v497_v7, 0.0  ;;  %v523_v8 = vmul.f32 %v521_v4, %v497_v7  ;;  %v507_v61 = vadd.f32 %v1122_v42, %v480_v49 }
 0x1c8   :  { %v531_v10 = vsel %vm514_vm2, %v497_v7, %v523_v8 }
 0x1c9   :  { %v555_v11 = vpack.c.bf16 %v531_v10, %v530_v9 }
 0x1cb   :  { %v451_v12 = vpop.f32.mrf.mxu3  ;;  %616 = vmatmul.bf16.vlgmr.msrb.gmra.mxu1 %v555_v11 }
 0x1cc   :  { %v498_v13 = vadd.f32 %v495_v2, %v451_v12 }
 0x1cd   :  { %v482_v59 = vpop.f32.mrf.mxu0 }
 0x1ce   :  { %v524_v15 = vmul.f32 %v521_v4, %v498_v13  ;;  %vm515_vm3 = vcmp.ge.f32.partialorder %v498_v13, 0.0  ;;  %v508_v0 = vadd.f32 %v1122_v42, %v482_v59 }
 0x1d0   :  { %v532_v18 = vsel %vm515_vm3, %v498_v13, %v524_v15 }
 0x1d3   :  { %v453_v14 = vpop.f32.mrf.mxu3 }
 0x1d4   :  { %v499_v16 = vadd.f32 %v495_v2, %v453_v14 }
 0x1d5   :  { %v485_v1 = vpop.f32.mrf.mxu0 }
 0x1d6   :  { %v525_v17 = vmul.f32 %v521_v4, %v499_v16  ;;  %vm516_vm4 = vcmp.ge.f32.partialorder %v499_v16, 0.0  ;;  %v509_v8 = vadd.f32 %v1122_v42, %v485_v1 }
 0x1d8   :  { %v533_v19 = vsel %vm516_vm4, %v499_v16, %v525_v17 }
 0x1d9   :  { %v556_v20 = vpack.c.bf16 %v533_v19, %v532_v18 }
 0x1db   :  { %v456_v21 = vpop.f32.mrf.mxu3  ;;  %621 = vmatmul.bf16.gmra.mxu1 %v556_v20 }
 0x1dc   :  { %v500_v22 = vadd.f32 %v495_v2, %v456_v21 }
 0x1dd   :  { %v487_v10 = vpop.f32.mrf.mxu0 }
 0x1de   :  { %v526_v24 = vmul.f32 %v521_v4, %v500_v22  ;;  %vm517_vm5 = vcmp.ge.f32.partialorder %v500_v22, 0.0  ;;  %v510_v15 = vadd.f32 %v1122_v42, %v487_v10 }
 0x1e0   :  { %v534_v27 = vsel %vm517_vm5, %v500_v22, %v526_v24 }
 0x1e3   :  { %v458_v23 = vpop.f32.mrf.mxu3 }
 0x1e4   :  { %v501_v25 = vadd.f32 %v495_v2, %v458_v23 }
 0x1e5   :  { %v490_v18 = vpop.f32.mrf.mxu0 }
 0x1e6   :  { %v527_v26 = vmul.f32 %v521_v4, %v501_v25  ;;  %vm518_vm6 = vcmp.ge.f32.partialorder %v501_v25, 0.0  ;;  %v511_v22 = vadd.f32 %v1122_v42, %v490_v18 }
 0x1e8   :  { %v535_v28 = vsel %vm518_vm6, %v501_v25, %v527_v26 }
 0x1e9   :  { %v557_v29 = vpack.c.bf16 %v535_v28, %v534_v27 }
 0x1eb   :  { %v461_v30 = vpop.f32.mrf.mxu3  ;;  %626 = vmatmul.bf16.gmra.mxu1 %v557_v29 }
 0x1ec   :  { %v502_v31 = vadd.f32 %v495_v2, %v461_v30 }
 0x1ed   :  { %v492_v26 = vpop.f32.mrf.mxu0 }
 0x1ee   :  { %v528_v34 = vmul.f32 %v521_v4, %v502_v31  ;;  %vm519_vm7 = vcmp.ge.f32.partialorder %v502_v31, 0.0  ;;  %v512_v29 = vadd.f32 %v1122_v42, %v492_v26 }
 0x1f0   :  { %v536_v37 = vsel %vm519_vm7, %v502_v31, %v528_v34 }
 0x1f3   :  { %v463_v33 = vpop.f32.mrf.mxu3 }
 0x1f4   :  { %v503_v35 = vadd.f32 %v495_v2, %v463_v33 }
 0x1f6   :  { %v529_v36 = vmul.f32 %v521_v4, %v503_v35  ;;  %vm520_vm8 = vcmp.ge.f32.partialorder %v503_v35, 0.0 }
 0x1f8   :  { %v537_v38 = vsel %vm520_vm8, %v503_v35, %v529_v36 }
 0x1f9   :  { %v558_v39 = vpack.c.bf16 %v537_v38, %v536_v37 }
 0x1fb   :  { %631 = vmatmul.bf16.gmra.mxu1 %v558_v39 }
 0x248   :  { %v617_v44 = vpop.f32.mrf.mxu1 }
 0x249   :  { %v618_v46 = vadd.f32 %v617_v44, %v1124_v43 }
 0x24b   :  { %v637_v48 = vadd.f32 %v618_v46, %v505_v45 }
 0x24d   :  { %vm645_vm9 = vcmp.ge.f32.partialorder %v637_v48, 0.0  ;;  %v654_v50 = vmul.f32 %v1129_v47, %v637_v48 }
 0x24f   :  { %v662_v51 = vsel %vm645_vm9, %v637_v48, %v654_v50 }
 0x250   :  { %670 = vst [vmem:[#allocation7] sm:$0xff] %v662_v51  ;;  %v619_v52 = vpop.f32.mrf.mxu1 }
 0x251   :  { %v620_v54 = vadd.f32 %v619_v52, %v1124_v43 }
 0x253   :  { %v638_v55 = vadd.f32 %v620_v54, %v506_v53 }
 0x255   :  { %vm646_vm10 = vcmp.ge.f32.partialorder %v638_v55, 0.0  ;;  %v655_v56 = vmul.f32 %v1129_v47, %v638_v55 }
 0x257   :  { %v663_v60 = vsel %vm646_vm10, %v638_v55, %v655_v56 }
 0x258   :  { %671 = vst [vmem:[#allocation7 + $0x8] sm:$0xff] %v663_v60  ;;  %v622_v32 = vpop.f32.mrf.mxu1 }
 0x259   :  { %v623_v62 = vadd.f32 %v622_v32, %v1124_v43 }
 0x25b   :  { %v639_v63 = vadd.f32 %v623_v62, %v507_v61 }
 0x25d   :  { %vm647_vm11 = vcmp.ge.f32.partialorder %v639_v63, 0.0  ;;  %v656_v57 = vmul.f32 %v1129_v47, %v639_v63 }
 0x25f   :  { %v664_v58 = vsel %vm647_vm11, %v639_v63, %v656_v57 }
 0x260   :  { %672 = vst [vmem:[#allocation7 + $0x10] sm:$0xff] %v664_v58  ;;  %v624_v2 = vpop.f32.mrf.mxu1 }
 0x261   :  { %v625_v3 = vadd.f32 %v624_v2, %v1124_v43 }
 0x263   :  { %v640_v4 = vadd.f32 %v625_v3, %v508_v0 }
 0x265   :  { %vm648_vm12 = vcmp.ge.f32.partialorder %v640_v4, 0.0  ;;  %v657_v5 = vmul.f32 %v1129_v47, %v640_v4 }
 0x267   :  { %v665_v6 = vsel %vm648_vm12, %v640_v4, %v657_v5 }
 0x268   :  { %673 = vst [vmem:[#allocation7 + $0x18] sm:$0xff] %v665_v6  ;;  %v627_v7 = vpop.f32.mrf.mxu1 }
 0x269   :  { %v628_v9 = vadd.f32 %v627_v7, %v1124_v43 }
 0x26b   :  { %v641_v11 = vadd.f32 %v628_v9, %v509_v8 }
 0x26d   :  { %vm649_vm13 = vcmp.ge.f32.partialorder %v641_v11, 0.0  ;;  %v658_v12 = vmul.f32 %v1129_v47, %v641_v11 }
 0x26f   :  { %v666_v13 = vsel %vm649_vm13, %v641_v11, %v658_v12 }
 0x270   :  { %674 = vst [vmem:[#allocation7 + $0x20] sm:$0xff] %v666_v13  ;;  %v629_v14 = vpop.f32.mrf.mxu1 }
 0x271   :  { %v630_v16 = vadd.f32 %v629_v14, %v1124_v43 }
 0x273   :  { %v642_v17 = vadd.f32 %v630_v16, %v510_v15 }
 0x275   :  { %vm650_vm14 = vcmp.ge.f32.partialorder %v642_v17, 0.0  ;;  %v659_v19 = vmul.f32 %v1129_v47, %v642_v17 }
 0x277   :  { %v667_v20 = vsel %vm650_vm14, %v642_v17, %v659_v19 }
 0x278   :  { %675 = vst [vmem:[#allocation7 + $0x28] sm:$0xff] %v667_v20  ;;  %v632_v21 = vpop.f32.mrf.mxu1 }
 0x279   :  { %v633_v23 = vadd.f32 %v632_v21, %v1124_v43 }
 0x27b   :  { %v643_v24 = vadd.f32 %v633_v23, %v511_v22 }
 0x27d   :  { %vm651_vm15 = vcmp.ge.f32.partialorder %v643_v24, 0.0  ;;  %v660_v25 = vmul.f32 %v1129_v47, %v643_v24 }
 0x27f   :  { %v668_v27 = vsel %vm651_vm15, %v643_v24, %v660_v25 }
 0x280   :  { %676 = vst [vmem:[#allocation7 + $0x30] sm:$0xff] %v668_v27  ;;  %v634_v28 = vpop.f32.mrf.mxu1 }
 0x281   :  { %v635_v30 = vadd.f32 %v634_v28, %v1124_v43 }
 0x283   :  { %v644_v31 = vadd.f32 %v635_v30, %v512_v29 }
 0x285   :  { %vm652_vm0 = vcmp.ge.f32.partialorder %v644_v31, 0.0  ;;  %v661_v33 = vmul.f32 %v1129_v47, %v644_v31 }
 0x287   :  { %v669_v34 = vsel %vm652_vm0, %v644_v31, %v661_v33 }
 0x288   :  { %677 = vst [vmem:[#allocation7 + $0x38] sm:$0xff] %v669_v34 }
 0x289   :  { %690 = dma.vmem_to_hbm [thread:$0]  %s683_s14, 1024, %s685_s17, [#allocation4], %s976_s26, %s976_s26, %s977_s27  }
 0x28a   :  { %973 = dma.done.wait [#allocation4], 1024  }
 0x28b   :  { %974 = vsyncadd [#allocation4], 4294966272 }
 0x28c   :  { %695 = vsyncpa [#allocation3], 1 }
 0x28d   :  { %696 = vsyncpa [#allocation6], 1 }
 0x28e   :  { %697 = vsyncpa [#allocation4], 1 }

</bundles_post_ra>
